<compile_context>
chip_gen: v7x
topology: tpu7x:2x2x1
jax: 0.10.0
libtpu: 0.0.40
codegen_flags: <defaults>
</compile_context>

<pallas_src>
import math
from functools import partial

import numpy as np
import jax
import jax.numpy as jnp
from jax.experimental import pallas as pl
from jax.experimental.pallas import tpu as pltpu


def _make_kernel_1d(k):
    """1-D taps whose outer product equals make_kernel(k) from the PyTorch reference."""
    k = np.asarray(k, dtype=np.float64)
    assert k.ndim == 1
    return (k / k.sum()).astype(np.float32)


def _downsample_kernel(x00_ref, x01_ref, x10_ref, x11_ref, o_ref, *,
                       taps_even, taps_odd, Ho, Wo):
    """Separable polyphase FIR + stride-2 decimation.

    x{r}{c}_ref: row-phase r, column-phase c of the padded input, (tile_bc, Hph, Wph).
    out[y, x] = sum_{i,j} k[i] * k[j] * xpad[2y+i, 2x+j]
    with i = 2a + r, j = 2b + c  ->  only unit-stride shifted adds inside the kernel.
    """
    def hpass(xe, xo):
        acc = None
        for a, t in enumerate(taps_even):
            term = t * xe[:, :, a:a + Wo]
            acc = term if acc is None else acc + term
        for a, t in enumerate(taps_odd):
            acc = acc + t * xo[:, :, a:a + Wo]
        return acc

    # Horizontal (4-tap) pass per row phase.
    th0 = hpass(x00_ref[...].astype(jnp.float32), x01_ref[...].astype(jnp.float32))
    th1 = hpass(x10_ref[...].astype(jnp.float32), x11_ref[...].astype(jnp.float32))

    # Vertical (4-tap) pass combining the two row phases.
    acc = None
    for a, t in enumerate(taps_even):
        term = t * th0[:, a:a + Ho, :]
        acc = term if acc is None else acc + term
    for a, t in enumerate(taps_odd):
        acc = acc + t * th1[:, a:a + Ho, :]

    o_ref[...] = acc.astype(o_ref.dtype)


def _largest_divisor_at_most(n, cap):
    cap = max(1, min(n, cap))
    for d in range(cap, 0, -1):
        if n % d == 0:
            return d
    return 1


def downsample(x, kernel=(1, 3, 3, 1), factor=2, *, max_tile_bc=None,
               vmem_block_budget_bytes=2 * 1024 * 1024):
    """StyleGAN2 Downsample.forward: blur with make_kernel(kernel), decimate by `factor`."""
    if factor != 2:
        raise NotImplementedError("polyphase kernel specialized to factor=2")
    k1d = _make_kernel_1d(kernel)
    K = int(k1d.shape[0])
    assert K % 2 == 0, "even-length FIR expected for the 2-phase decomposition"
    taps_even = [float(k1d[i]) for i in range(0, K, 2)]   # taps at even offsets
    taps_odd = [float(k1d[i]) for i in range(1, K, 2)]    # taps at odd offsets

    p = K - factor
    pad0, pad1 = (p + 1) // 2, p // 2

    B, C, H, W = x.shape
    Hp, Wp = H + pad0 + pad1, W + pad0 + pad1
    Ho = (Hp - K) // factor + 1
    Wo = (Wp - K) // factor + 1
    A = K // 2                           # taps per phase
    Hph, Wph = Ho + A - 1, Wo + A - 1    # rows / cols needed per phase

    BC = B * C
    xp = jnp.pad(x.reshape(BC, H, W), ((0, 0), (pad0, pad1), (pad0, pad1)))

    def phase(r, c):
        return xp[:, r::factor, :][:, :Hph, :][:, :, c::factor][:, :, :Wph]

    phases = [phase(0, 0), phase(0, 1), phase(1, 0), phase(1, 1)]

    # Largest B*C tile whose (4 inputs + 1 output, double-buffered) footprint stays
    # comfortably inside scoped VMEM — amortizes per-grid-step overhead.
    bytes_per_bc = (4 * Hph * Wph + Ho * Wo) * 4
    cap = max(1, vmem_block_budget_bytes // max(bytes_per_bc, 1))
    if max_tile_bc is not None:
        cap = min(cap, max_tile_bc)
    tile_bc = _largest_divisor_at_most(BC, cap)
    grid = (BC // tile_bc,)

    in_spec = pl.BlockSpec((tile_bc, Hph, Wph), lambda b: (b, 0, 0))
    out = pl.pallas_call(
        partial(_downsample_kernel, taps_even=taps_even, taps_odd=taps_odd, Ho=Ho, Wo=Wo),
        grid=grid,
        in_specs=[in_spec, in_spec, in_spec, in_spec],
        out_specs=pl.BlockSpec((tile_bc, Ho, Wo), lambda b: (b, 0, 0)),
        out_shape=jax.ShapeDtypeStruct((BC, Ho, Wo), x.dtype),
        compiler_params=pltpu.CompilerParams(dimension_semantics=("parallel",)),
    )(*phases)
    return out.reshape(B, C, Ho, Wo)


def downsample_ref(x, kernel=(1, 3, 3, 1), factor=2):
    """Pure-jnp reference for upfirdn2d(x, make_kernel(kernel), up=1, down=factor, pad)."""
    k1 = np.asarray(kernel, np.float32)
    k2 = np.outer(k1, k1)
    k2 = k2 / k2.sum()
    K = k2.shape[0]
    p = K - factor
    pad0, pad1 = (p + 1) // 2, p // 2
    xp = jnp.pad(x, ((0, 0), (0, 0), (pad0, pad1), (pad0, pad1)))
    Hp, Wp = xp.shape[2], xp.shape[3]
    Ho = (Hp - K) // factor + 1
    Wo = (Wp - K) // factor + 1
    out = jnp.zeros(x.shape[:2] + (Ho, Wo), jnp.float32)
    # (kernel flip in upfirdn2d is a no-op: the blur kernel is symmetric)
    for i in range(K):
        for j in range(K):
            out = out + k2[i, j] * xp[:, :, i:i + factor * Ho:factor, j:j + factor * Wo:factor]
    return out.astype(x.dtype)


if __name__ == "__main__":
    key = jax.random.PRNGKey(0)
    ka, kb = jax.random.split(key)

    # Small NCHW shape consistent with the module.
    x = jax.random.normal(ka, (2, 4, 16, 16), jnp.float32)
    y = jax.block_until_ready(downsample(x))
    assert y.shape == (2, 4, 8, 8), y.shape
    y_ref = downsample_ref(x)
    assert np.allclose(np.asarray(y), np.asarray(y_ref), rtol=1e-5, atol=1e-5)

    # Second shape exercising a multi-step ("parallel") B*C grid.
    x2 = jax.random.normal(kb, (2, 64, 32, 32), jnp.float32)
    y2 = jax.block_until_ready(downsample(x2, max_tile_bc=32))
    assert y2.shape == (2, 64, 16, 16), y2.shape
    y2_ref = downsample_ref(x2)
    assert np.allclose(np.asarray(y2), np.asarray(y2_ref), rtol=1e-5, atol=1e-5)

    print("KERNEL_OK")
</pallas_src>

<mosaic_0001>
module attributes {stable_mosaic.version = 11 : i64} {
  func.func @_downsample_kernel(%arg0: i32, %arg1: memref<8x9x9xf32, #tpu.memory_space<vmem>>, %arg2: memref<8x9x9xf32, #tpu.memory_space<vmem>>, %arg3: memref<8x9x9xf32, #tpu.memory_space<vmem>>, %arg4: memref<8x9x9xf32, #tpu.memory_space<vmem>>, %arg5: memref<8x8x8xf32, #tpu.memory_space<vmem>>) attributes {dimension_semantics = [#tpu.dimension_semantics<parallel>], iteration_bounds = array<i64: 1>, scalar_prefetch = 0 : i64, scratch_operands = 0 : i64, tpu.core_type = #tpu.core_type<tc>, window_params = [{transform_indices = @transform_0, window_bounds = array<i64: 8, 9, 9>}, {transform_indices = @transform_1, window_bounds = array<i64: 8, 9, 9>}, {transform_indices = @transform_2, window_bounds = array<i64: 8, 9, 9>}, {transform_indices = @transform_3, window_bounds = array<i64: 8, 9, 9>}, {transform_indices = @transform_4, window_bounds = array<i64: 8, 8, 8>}]} {
    %c0 = arith.constant 0 : index
    %c0_0 = arith.constant 0 : index
    %c0_1 = arith.constant 0 : index
    %0 = vector.load %arg1[%c0, %c0_0, %c0_1] : memref<8x9x9xf32, #tpu.memory_space<vmem>>, vector<8x9x9xf32>
    %c0_2 = arith.constant 0 : index
    %c0_3 = arith.constant 0 : index
    %c0_4 = arith.constant 0 : index
    %1 = vector.load %arg2[%c0_2, %c0_3, %c0_4] : memref<8x9x9xf32, #tpu.memory_space<vmem>>, vector<8x9x9xf32>
    %2 = vector.extract_strided_slice %0 {offsets = [0, 0, 0], sizes = [8, 9, 8], strides = [1, 1, 1]} : vector<8x9x9xf32> to vector<8x9x8xf32>
    %cst = arith.constant 1.250000e-01 : f32
    %3 = vector.broadcast %cst : f32 to vector<8x9x8xf32>
    %4 = arith.mulf %3, %2 : vector<8x9x8xf32>
    %5 = vector.extract_strided_slice %0 {offsets = [0, 0, 1], sizes = [8, 9, 8], strides = [1, 1, 1]} : vector<8x9x9xf32> to vector<8x9x8xf32>
    %cst_5 = arith.constant 3.750000e-01 : f32
    %6 = vector.broadcast %cst_5 : f32 to vector<8x9x8xf32>
    %7 = arith.mulf %6, %5 : vector<8x9x8xf32>
    %8 = arith.addf %4, %7 : vector<8x9x8xf32>
    %9 = vector.extract_strided_slice %1 {offsets = [0, 0, 0], sizes = [8, 9, 8], strides = [1, 1, 1]} : vector<8x9x9xf32> to vector<8x9x8xf32>
    %cst_6 = arith.constant 3.750000e-01 : f32
    %10 = vector.broadcast %cst_6 : f32 to vector<8x9x8xf32>
    %11 = arith.mulf %10, %9 : vector<8x9x8xf32>
    %12 = arith.addf %8, %11 : vector<8x9x8xf32>
    %13 = vector.extract_strided_slice %1 {offsets = [0, 0, 1], sizes = [8, 9, 8], strides = [1, 1, 1]} : vector<8x9x9xf32> to vector<8x9x8xf32>
    %cst_7 = arith.constant 1.250000e-01 : f32
    %14 = vector.broadcast %cst_7 : f32 to vector<8x9x8xf32>
    %15 = arith.mulf %14, %13 : vector<8x9x8xf32>
    %16 = arith.addf %12, %15 : vector<8x9x8xf32>
    %c0_8 = arith.constant 0 : index
    %c0_9 = arith.constant 0 : index
    %c0_10 = arith.constant 0 : index
    %17 = vector.load %arg3[%c0_8, %c0_9, %c0_10] : memref<8x9x9xf32, #tpu.memory_space<vmem>>, vector<8x9x9xf32>
    %c0_11 = arith.constant 0 : index
    %c0_12 = arith.constant 0 : index
    %c0_13 = arith.constant 0 : index
    %18 = vector.load %arg4[%c0_11, %c0_12, %c0_13] : memref<8x9x9xf32, #tpu.memory_space<vmem>>, vector<8x9x9xf32>
    %19 = vector.extract_strided_slice %17 {offsets = [0, 0, 0], sizes = [8, 9, 8], strides = [1, 1, 1]} : vector<8x9x9xf32> to vector<8x9x8xf32>
    %cst_14 = arith.constant 1.250000e-01 : f32
    %20 = vector.broadcast %cst_14 : f32 to vector<8x9x8xf32>
    %21 = arith.mulf %20, %19 : vector<8x9x8xf32>
    %22 = vector.extract_strided_slice %17 {offsets = [0, 0, 1], sizes = [8, 9, 8], strides = [1, 1, 1]} : vector<8x9x9xf32> to vector<8x9x8xf32>
    %cst_15 = arith.constant 3.750000e-01 : f32
    %23 = vector.broadcast %cst_15 : f32 to vector<8x9x8xf32>
    %24 = arith.mulf %23, %22 : vector<8x9x8xf32>
    %25 = arith.addf %21, %24 : vector<8x9x8xf32>
    %26 = vector.extract_strided_slice %18 {offsets = [0, 0, 0], sizes = [8, 9, 8], strides = [1, 1, 1]} : vector<8x9x9xf32> to vector<8x9x8xf32>
    %cst_16 = arith.constant 3.750000e-01 : f32
    %27 = vector.broadcast %cst_16 : f32 to vector<8x9x8xf32>
    %28 = arith.mulf %27, %26 : vector<8x9x8xf32>
    %29 = arith.addf %25, %28 : vector<8x9x8xf32>
    %30 = vector.extract_strided_slice %18 {offsets = [0, 0, 1], sizes = [8, 9, 8], strides = [1, 1, 1]} : vector<8x9x9xf32> to vector<8x9x8xf32>
    %cst_17 = arith.constant 1.250000e-01 : f32
    %31 = vector.broadcast %cst_17 : f32 to vector<8x9x8xf32>
    %32 = arith.mulf %31, %30 : vector<8x9x8xf32>
    %33 = arith.addf %29, %32 : vector<8x9x8xf32>
    %34 = vector.extract_strided_slice %16 {offsets = [0, 0, 0], sizes = [8, 8, 8], strides = [1, 1, 1]} : vector<8x9x8xf32> to vector<8x8x8xf32>
    %cst_18 = arith.constant 1.250000e-01 : f32
    %35 = vector.broadcast %cst_18 : f32 to vector<8x8x8xf32>
    %36 = arith.mulf %35, %34 : vector<8x8x8xf32>
    %37 = vector.extract_strided_slice %16 {offsets = [0, 1, 0], sizes = [8, 8, 8], strides = [1, 1, 1]} : vector<8x9x8xf32> to vector<8x8x8xf32>
    %cst_19 = arith.constant 3.750000e-01 : f32
    %38 = vector.broadcast %cst_19 : f32 to vector<8x8x8xf32>
    %39 = arith.mulf %38, %37 : vector<8x8x8xf32>
    %40 = arith.addf %36, %39 : vector<8x8x8xf32>
    %41 = vector.extract_strided_slice %33 {offsets = [0, 0, 0], sizes = [8, 8, 8], strides = [1, 1, 1]} : vector<8x9x8xf32> to vector<8x8x8xf32>
    %cst_20 = arith.constant 3.750000e-01 : f32
    %42 = vector.broadcast %cst_20 : f32 to vector<8x8x8xf32>
    %43 = arith.mulf %42, %41 : vector<8x8x8xf32>
    %44 = arith.addf %40, %43 : vector<8x8x8xf32>
    %45 = vector.extract_strided_slice %33 {offsets = [0, 1, 0], sizes = [8, 8, 8], strides = [1, 1, 1]} : vector<8x9x8xf32> to vector<8x8x8xf32>
    %cst_21 = arith.constant 1.250000e-01 : f32
    %46 = vector.broadcast %cst_21 : f32 to vector<8x8x8xf32>
    %47 = arith.mulf %46, %45 : vector<8x8x8xf32>
    %48 = arith.addf %44, %47 : vector<8x8x8xf32>
    %c0_22 = arith.constant 0 : index
    %c0_23 = arith.constant 0 : index
    %c0_24 = arith.constant 0 : index
    %49 = vector.load %arg5[%c0_22, %c0_23, %c0_24] : memref<8x8x8xf32, #tpu.memory_space<vmem>>, vector<8x8x8xf32>
    tpu.vector_store %arg5[%c0_22, %c0_23, %c0_24], %48 {strides = array<i32>} : memref<8x8x8xf32, #tpu.memory_space<vmem>>, vector<8x8x8xf32>,
    return
  }
  func.func @transform_0(%arg0: i32) -> (i32, i32, i32) {
    %c0_i32 = arith.constant 0 : i32
    %c0_i32_0 = arith.constant 0 : i32
    %c0_i32_1 = arith.constant 0 : i32
    return %arg0, %c0_i32, %c0_i32_0 : i32, i32, i32
  }
  func.func @transform_1(%arg0: i32) -> (i32, i32, i32) {
    %c0_i32 = arith.constant 0 : i32
    %c0_i32_0 = arith.constant 0 : i32
    %c0_i32_1 = arith.constant 0 : i32
    return %arg0, %c0_i32, %c0_i32_0 : i32, i32, i32
  }
  func.func @transform_2(%arg0: i32) -> (i32, i32, i32) {
    %c0_i32 = arith.constant 0 : i32
    %c0_i32_0 = arith.constant 0 : i32
    %c0_i32_1 = arith.constant 0 : i32
    return %arg0, %c0_i32, %c0_i32_0 : i32, i32, i32
  }
  func.func @transform_3(%arg0: i32) -> (i32, i32, i32) {
    %c0_i32 = arith.constant 0 : i32
    %c0_i32_0 = arith.constant 0 : i32
    %c0_i32_1 = arith.constant 0 : i32
    return %arg0, %c0_i32, %c0_i32_0 : i32, i32, i32
  }
  func.func @transform_4(%arg0: i32) -> (i32, i32, i32) {
    %c0_i32 = arith.constant 0 : i32
    %c0_i32_0 = arith.constant 0 : i32
    %c0_i32_1 = arith.constant 0 : i32
    return %arg0, %c0_i32, %c0_i32_0 : i32, i32, i32
  }
}

</mosaic_0001>

<bundles_post_ra>
// kernel: tpu_custom_call.1
= control target key start
LH: loop header
LB: loop body
LE: loop exit
PB: predicated region body
PF: predicated region fallthrough
CT: control target
= control target key end

     0   :  { %s784_s23 = smov 127   ;;  %s1481_s0 = inlined_call_operand.vmem [shape: f32[8,9,9], index: 0, kind: input, shape index: {}]   ;;  %s1482_s1 = inlined_call_operand.vmem [shape: f32[8,9,9], index: 1, kind: input, shape index: {}]   ;;  %s1483_s2 = inlined_call_operand.vmem [shape: f32[8,9,9], index: 2, kind: input, shape index: {}]   ;;  %s1484_s3 = inlined_call_operand.vmem [shape: f32[8,9,9], index: 3, kind: input, shape index: {}]   ;;  %s1485_s4 = inlined_call_operand.hbm [shape: f32[8,8,8], index: 4, kind: output, shape index: {}]  }
   0x1   :  { %v816_v0 = vld [vmem:[%s1481_s0 + $0x10] sm:$0xff]  ;;  %v821_v1 = vld [vmem:[%s1481_s0] sm:$0xff]  ;;  %v826_v2 = vld [vmem:[%s1481_s0 + $0x18] sm:$0x1] }
   0x2   :  { %v68_v3 = vmul.f32 0.375, %v816_v0  ;;  %v66_v4 = vmul.f32 0.375, %v821_v1  ;;  %v833_v5 = vld [vmem:[%s1481_s0 + $0x8] sm:$0x1]  ;;  %v69_v6 = vmul.f32 0.375, %v826_v2  ;;  %v847_v9 = vld [vmem:[%s1481_s0 + $0x20] sm:$0xff] }
   0x3   :  { %v67_v7 = vmul.f32 0.375, %v833_v5  ;;  %v842_v8 = vld [vmem:[%s1481_s0 + $0x28] sm:$0x1]  ;;  %v70_v11 = vmul.f32 0.375, %v847_v9  ;;  %v856_v12 = vld [vmem:[%s1481_s0 + $0x38] sm:$0x1] }
   0x4   :  { %102 = vrot.lane.b32.xlu1 %v68_v3, %s784_s23  ;;  %98 = vrot.lane.b32.xlu0 %v66_v4, %s784_s23  ;;  %v71_v10 = vmul.f32 0.375, %v842_v8  ;;  %v861_v13 = vld [vmem:[%s1481_s0 + $0x30] sm:$0xff]  ;;  %v73_v14 = vmul.f32 0.375, %v856_v12  ;;  %v870_v16 = vld [vmem:[%s1481_s0 + $0x48] sm:$0x1] }
   0x5   :  { %v72_v15 = vmul.f32 0.375, %v861_v13  ;;  %v875_v17 = vld [vmem:[%s1481_s0 + $0x40] sm:$0xff]  ;;  %v75_v18 = vmul.f32 0.375, %v870_v16  ;;  %v884_v20 = vld [vmem:[%s1481_s0 + $0x58] sm:$0x1]  ;;  %v889_v21 = vld [vmem:[%s1481_s0 + $0x50] sm:$0xff] }
   0x6   :  { %v74_v19 = vmul.f32 0.375, %v875_v17  ;;  %v77_v22 = vmul.f32 0.375, %v884_v20  ;;  %v76_v23 = vmul.f32 0.375, %v889_v21  ;;  %v898_v24 = vld [vmem:[%s1481_s0 + $0x68] sm:$0x1]  ;;  %v903_v25 = vld [vmem:[%s1481_s0 + $0x60] sm:$0xff] }
   0x7   :  { %v79_v26 = vmul.f32 0.375, %v898_v24  ;;  %v78_v27 = vmul.f32 0.375, %v903_v25  ;;  %v912_v28 = vld [vmem:[%s1481_s0 + $0x78] sm:$0x1]  ;;  %v917_v29 = vld [vmem:[%s1481_s0 + $0x70] sm:$0xff]  ;;  %v931_v33 = vld [vmem:[%s1482_s1] sm:$0xff] }
   0x8   :  { %104 = vrot.lane.b32.xlu1 %v69_v6, %s784_s23  ;;  %100 = vrot.lane.b32.xlu0 %v67_v7, %s784_s23  ;;  %v81_v30 = vmul.f32 0.375, %v912_v28  ;;  %v80_v31 = vmul.f32 0.375, %v917_v29  ;;  %v926_v32 = vld [vmem:[%s1482_s1 + $0x8] sm:$0x1] }
   0xc   :  { %108 = vrot.lane.b32.xlu1 %v71_v10, %s784_s23  ;;  %106 = vrot.lane.b32.xlu0 %v70_v11, %s784_s23 }
  0x10   :  { %112 = vrot.lane.b32.xlu1 %v73_v14, %s784_s23  ;;  %110 = vrot.lane.b32.xlu0 %v72_v15, %s784_s23 }
  0x14   :  { %116 = vrot.lane.b32.xlu1 %v75_v18, %s784_s23  ;;  %114 = vrot.lane.b32.xlu0 %v74_v19, %s784_s23 }
  0x18   :  { %120 = vrot.lane.b32.xlu1 %v77_v22, %s784_s23  ;;  %118 = vrot.lane.b32.xlu0 %v76_v23, %s784_s23 }
  0x1c   :  { %124 = vrot.lane.b32.xlu1 %v79_v26, %s784_s23  ;;  %122 = vrot.lane.b32.xlu0 %v78_v27, %s784_s23 }
  0x1d   :  { %9 = vsyncpa [#allocation3], 0  ;;  %v195_v34 = vmul.f32 0.125, %v926_v32  ;;  %v194_v35 = vmul.f32 0.125, %v931_v33  ;;  %v940_v36 = vld [vmem:[%s1482_s1 + $0x18] sm:$0x1] }
  0x1e   :  { %v945_v37 = vld [vmem:[%s1482_s1 + $0x10] sm:$0xff]  ;;  %v197_v38 = vmul.f32 0.125, %v940_v36  ;;  %v954_v40 = vld [vmem:[%s1482_s1 + $0x28] sm:$0x1]  ;;  %v959_v41 = vld [vmem:[%s1482_s1 + $0x20] sm:$0xff]  ;;  %vm602_vm0 = vcmask 1046528  }
  0x1f   :  { %v196_v39 = vmul.f32 0.125, %v945_v37  ;;  %v199_v42 = vmul.f32 0.125, %v954_v40  ;;  %v198_v43 = vmul.f32 0.125, %v959_v41  ;;  %v968_v44 = vld [vmem:[%s1482_s1 + $0x38] sm:$0x1]  ;;  %v973_v45 = vld [vmem:[%s1482_s1 + $0x30] sm:$0xff] }
  0x20   :  { %128 = vrot.lane.b32.xlu1 %v81_v30, %s784_s23  ;;  %126 = vrot.lane.b32.xlu0 %v80_v31, %s784_s23  ;;  %v201_v46 = vmul.f32 0.125, %v968_v44  ;;  %v200_v47 = vmul.f32 0.125, %v973_v45  ;;  %v982_v48 = vld [vmem:[%s1482_s1 + $0x48] sm:$0x1]  ;;  %v987_v49 = vld [vmem:[%s1482_s1 + $0x40] sm:$0xff]  ;;  %vm731_vm1 = vcmask 64512  }
  0x21   :  { %v203_v50 = vmul.f32 0.125, %v982_v48  ;;  %v202_v51 = vmul.f32 0.125, %v987_v49  ;;  %v996_v52 = vld [vmem:[%s1482_s1 + $0x58] sm:$0x1]  ;;  %v1001_v53 = vld [vmem:[%s1482_s1 + $0x50] sm:$0xff]  ;;  %v1015_v57 = vld [vmem:[%s1482_s1 + $0x60] sm:$0xff] }
  0x22   :  { %v205_v54 = vmul.f32 0.125, %v996_v52  ;;  %v204_v55 = vmul.f32 0.125, %v1001_v53  ;;  %v1010_v56 = vld [vmem:[%s1482_s1 + $0x68] sm:$0x1]  ;;  %v206_v59 = vmul.f32 0.125, %v1015_v57  ;;  %v1029_v61 = vld [vmem:[%s1482_s1 + $0x70] sm:$0xff] }
  0x23   :  { %v207_v58 = vmul.f32 0.125, %v1010_v56  ;;  %v1024_v60 = vld [vmem:[%s1482_s1 + $0x78] sm:$0x1]  ;;  %v208_v63 = vmul.f32 0.125, %v1029_v61  ;;  %v1038_v3 = vld [vmem:[%s1483_s2 + $0x8] sm:$0x1] }
  0x24   :  { %228 = vrot.lane.b32.xlu1 %v195_v34, %s784_s23  ;;  %226 = vrot.lane.b32.xlu0 %v194_v35, %s784_s23  ;;  %v209_v62 = vmul.f32 0.125, %v1024_v60  ;;  %v1043_v4 = vld [vmem:[%s1483_s2] sm:$0xff]  ;;  %v339_v6 = vmul.f32 0.375, %v1038_v3  ;;  %v1052_v10 = vld [vmem:[%s1483_s2 + $0x18] sm:$0x1] }
  0x25   :  { %v338_v7 = vmul.f32 0.375, %v1043_v4  ;;  %v1057_v11 = vld [vmem:[%s1483_s2 + $0x10] sm:$0xff]  ;;  %v341_v14 = vmul.f32 0.375, %v1052_v10  ;;  %v1066_v18 = vld [vmem:[%s1483_s2 + $0x28] sm:$0x1]  ;;  %v1071_v19 = vld [vmem:[%s1483_s2 + $0x20] sm:$0xff] }
  0x26   :  { %v340_v15 = vmul.f32 0.375, %v1057_v11  ;;  %v343_v22 = vmul.f32 0.375, %v1066_v18  ;;  %v342_v23 = vmul.f32 0.375, %v1071_v19  ;;  %v1080_v26 = vld [vmem:[%s1483_s2 + $0x38] sm:$0x1]  ;;  %v1085_v27 = vld [vmem:[%s1483_s2 + $0x30] sm:$0xff] }
  0x27   :  { %v345_v30 = vmul.f32 0.375, %v1080_v26  ;;  %v344_v31 = vmul.f32 0.375, %v1085_v27  ;;  %v1094_v34 = vld [vmem:[%s1483_s2 + $0x48] sm:$0x1]  ;;  %v1099_v35 = vld [vmem:[%s1483_s2 + $0x40] sm:$0xff] }
  0x28   :  { %232 = vrot.lane.b32.xlu1 %v197_v38, %s784_s23  ;;  %230 = vrot.lane.b32.xlu0 %v196_v39, %s784_s23  ;;  %v347_v38 = vmul.f32 0.375, %v1094_v34  ;;  %v346_v39 = vmul.f32 0.375, %v1099_v35 }
  0x2c   :  { %236 = vrot.lane.b32.xlu1 %v199_v42, %s784_s23  ;;  %234 = vrot.lane.b32.xlu0 %v198_v43, %s784_s23  ;;  %v1108_v42 = vld [vmem:[%s1483_s2 + $0x58] sm:$0x1]  ;;  %v1113_v43 = vld [vmem:[%s1483_s2 + $0x50] sm:$0xff] }
  0x2d   :  { %1498 = vst [vmem:[#allocation5_spill] sm:$0xff] %v1108_v42  ;;  %1499 = vst [vmem:[#allocation6_spill] sm:$0xff] %v1113_v43 }
  0x30   :  { %240 = vrot.lane.b32.xlu1 %v201_v46, %s784_s23  ;;  %238 = vrot.lane.b32.xlu0 %v200_v47, %s784_s23  ;;  %v349_v46 = vmul.f32 0.375, %v1108_v42  ;;  %v348_v47 = vmul.f32 0.375, %v1113_v43  ;;  %v51_v42 = vmul.f32 0.125, %v833_v5 }
  0x34   :  { %244 = vrot.lane.b32.xlu1 %v203_v50, %s784_s23  ;;  %242 = vrot.lane.b32.xlu0 %v202_v51, %s784_s23  ;;  %v1122_v50 = vld [vmem:[%s1483_s2 + $0x68] sm:$0x1]  ;;  %v1127_v51 = vld [vmem:[%s1483_s2 + $0x60] sm:$0xff] }
  0x35   :  { %1500 = vst [vmem:[#allocation7_spill] sm:$0xff] %v1122_v50  ;;  %1501 = vst [vmem:[#allocation8_spill] sm:$0xff] %v1127_v51 }
  0x38   :  { %248 = vrot.lane.b32.xlu1 %v205_v54, %s784_s23  ;;  %246 = vrot.lane.b32.xlu0 %v204_v55, %s784_s23  ;;  %v351_v54 = vmul.f32 0.375, %v1122_v50  ;;  %v350_v55 = vmul.f32 0.375, %v1127_v51  ;;  %v1236_v51 = vld [vmem:[%s1484_s3 + $0x68] sm:$0x1]  ;;  %v1241_v50 = vld [vmem:[%s1484_s3 + $0x60] sm:$0xff] }
  0x39   :  { %1508 = vst [vmem:[#allocation15_spill] sm:$0xff] %v1236_v51  ;;  %1509 = vst [vmem:[#allocation16_spill] sm:$0xff] %v1241_v50 }
  0x3c   :  { %252 = vrot.lane.b32.xlu1 %v207_v58, %s784_s23  ;;  %250 = vrot.lane.b32.xlu0 %v206_v59, %s784_s23  ;;  %v1136_v58 = vld [vmem:[%s1483_s2 + $0x78] sm:$0x1]  ;;  %v1141_v59 = vld [vmem:[%s1483_s2 + $0x70] sm:$0xff] }
  0x3d   :  { %1502 = vst [vmem:[#allocation9_spill] sm:$0xff] %v1136_v58  ;;  %1503 = vst [vmem:[#allocation10_spill] sm:$0xff] %v1141_v59 }
  0x40   :  { %256 = vrot.lane.b32.xlu1 %v209_v62, %s784_s23  ;;  %254 = vrot.lane.b32.xlu0 %v208_v63, %s784_s23  ;;  %v353_v62 = vmul.f32 0.375, %v1136_v58  ;;  %v352_v63 = vmul.f32 0.375, %v1141_v59  ;;  %v52_v59 = vmul.f32 0.125, %v816_v0  ;;  %v162_v0 = vmul.f32 0.375, %v931_v33  ;;  %v1254_v33 = vld [vmem:[%s1484_s3 + $0x78] sm:$0x1] }
  0x44   :  { %372 = vrot.lane.b32.xlu1 %v339_v6, %s784_s23  ;;  %370 = vrot.lane.b32.xlu0 %v338_v7, %s784_s23  ;;  %v1150_v6 = vld [vmem:[%s1484_s3 + $0x8] sm:$0x1]  ;;  %v1155_v7 = vld [vmem:[%s1484_s3] sm:$0xff] }
  0x48   :  { %376 = vrot.lane.b32.xlu1 %v341_v14, %s784_s23  ;;  %374 = vrot.lane.b32.xlu0 %v340_v15, %s784_s23  ;;  %v467_v14 = vmul.f32 0.125, %v1150_v6  ;;  %v466_v15 = vmul.f32 0.125, %v1155_v7 }
  0x4c   :  { %380 = vrot.lane.b32.xlu1 %v343_v22, %s784_s23  ;;  %378 = vrot.lane.b32.xlu0 %v342_v23, %s784_s23  ;;  %v1164_v22 = vld [vmem:[%s1484_s3 + $0x18] sm:$0x1]  ;;  %v1169_v23 = vld [vmem:[%s1484_s3 + $0x10] sm:$0xff] }
  0x50   :  { %384 = vrot.lane.b32.xlu1 %v345_v30, %s784_s23  ;;  %382 = vrot.lane.b32.xlu0 %v344_v31, %s784_s23  ;;  %v469_v30 = vmul.f32 0.125, %v1164_v22  ;;  %v468_v31 = vmul.f32 0.125, %v1169_v23 }
  0x54   :  { %388 = vrot.lane.b32.xlu1 %v347_v38, %s784_s23  ;;  %386 = vrot.lane.b32.xlu0 %v346_v39, %s784_s23  ;;  %v1178_v38 = vld [vmem:[%s1484_s3 + $0x28] sm:$0x1]  ;;  %v1183_v39 = vld [vmem:[%s1484_s3 + $0x20] sm:$0xff] }
  0x58   :  { %392 = vrot.lane.b32.xlu1 %v349_v46, %s784_s23  ;;  %390 = vrot.lane.b32.xlu0 %v348_v47, %s784_s23  ;;  %v471_v46 = vmul.f32 0.125, %v1178_v38  ;;  %v470_v47 = vmul.f32 0.125, %v1183_v39 }
  0x5c   :  { %396 = vrot.lane.b32.xlu1 %v351_v54, %s784_s23  ;;  %394 = vrot.lane.b32.xlu0 %v350_v55, %s784_s23  ;;  %v1192_v54 = vld [vmem:[%s1484_s3 + $0x38] sm:$0x1]  ;;  %v1197_v55 = vld [vmem:[%s1484_s3 + $0x30] sm:$0xff] }
  0x60   :  { %400 = vrot.lane.b32.xlu1 %v353_v62, %s784_s23  ;;  %398 = vrot.lane.b32.xlu0 %v352_v63, %s784_s23  ;;  %v473_v62 = vmul.f32 0.125, %v1192_v54  ;;  %v472_v63 = vmul.f32 0.125, %v1197_v55 }
  0x64   :  { %500 = vrot.lane.b32.xlu1 %v467_v14, %s784_s23  ;;  %498 = vrot.lane.b32.xlu0 %v466_v15, %s784_s23  ;;  %v1206_v14 = vld [vmem:[%s1484_s3 + $0x48] sm:$0x1]  ;;  %v1211_v15 = vld [vmem:[%s1484_s3 + $0x40] sm:$0xff] }
  0x65   :  { %1504 = vst [vmem:[#allocation11_spill] sm:$0xff] %v1206_v14  ;;  %1505 = vst [vmem:[#allocation12_spill] sm:$0xff] %v1211_v15 }
  0x68   :  { %504 = vrot.lane.b32.xlu1 %v469_v30, %s784_s23  ;;  %502 = vrot.lane.b32.xlu0 %v468_v31, %s784_s23  ;;  %v475_v30 = vmul.f32 0.125, %v1206_v14  ;;  %v474_v31 = vmul.f32 0.125, %v1211_v15  ;;  %v479_v15 = vmul.f32 0.125, %v1236_v51  ;;  %v478_v14 = vmul.f32 0.125, %v1241_v50 }
  0x69   :  { %v55_v50 = vmul.f32 0.125, %v842_v8  ;;  %v54_v51 = vmul.f32 0.125, %v847_v9 }
  0x6c   :  { %508 = vrot.lane.b32.xlu1 %v471_v46, %s784_s23  ;;  %506 = vrot.lane.b32.xlu0 %v470_v47, %s784_s23  ;;  %v1220_v46 = vld [vmem:[%s1484_s3 + $0x58] sm:$0x1]  ;;  %v1225_v47 = vld [vmem:[%s1484_s3 + $0x50] sm:$0xff] }
  0x6d   :  { %1506 = vst [vmem:[#allocation13_spill] sm:$0xff] %v1220_v46  ;;  %1507 = vst [vmem:[#allocation14_spill] sm:$0xff] %v1225_v47  ;;  %v476_v58 = vmul.f32 0.125, %v1225_v47  ;;  %v53_v47 = vmul.f32 0.125, %v826_v2  ;;  %v163_v2 = vmul.f32 0.375, %v926_v32  ;;  %v481_v32 = vmul.f32 0.125, %v1254_v33 }
  0x70   :  { %512 = vrot.lane.b32.xlu1 %v473_v62, %s784_s23  ;;  %510 = vrot.lane.b32.xlu0 %v472_v63, %s784_s23  ;;  %v50_v62 = vmul.f32 0.125, %v821_v1  ;;  %v477_v63 = vmul.f32 0.125, %v1220_v46  ;;  %v164_v1 = vmul.f32 0.375, %v945_v37  ;;  %v1259_v37 = vld [vmem:[%s1484_s3 + $0x70] sm:$0xff]  ;;  %s785_s3 = smov [#allocation2]  }
  0x74   :  { %516 = vrot.lane.b32.xlu1 %v475_v30, %s784_s23  ;;  %514 = vrot.lane.b32.xlu0 %v474_v31, %s784_s23 }
  0x76   :  { %v103_v30 = vpop.permute.xlu1 %102  ;;  %v99_v31 = vpop.permute.xlu0 %98 }
  0x77   :  { %v148_v43 = vadd.f32 %v103_v30, %v52_v59  ;;  %v146_v46 = vadd.f32 %v99_v31, %v50_v62 }
  0x78   :  { %520 = vrot.lane.b32.xlu1 %v477_v63, %s784_s23  ;;  %518 = vrot.lane.b32.xlu0 %v476_v58, %s784_s23  ;;  %v165_v58 = vmul.f32 0.375, %v940_v36 }
  0x79   :  { %v1262_v5 = vadd.f32 %v162_v0, %v146_v46  ;;  %v1265_v59 = vadd.f32 %v164_v1, %v148_v43  ;;  %v480_v46 = vmul.f32 0.125, %v1259_v37  ;;  %v167_v43 = vmul.f32 0.375, %v954_v40 }
  0x7a   :  { %v105_v62 = vpop.permute.xlu1 %104  ;;  %v101_v63 = vpop.permute.xlu0 %100  ;;  %v169_v40 = vmul.f32 0.375, %v968_v44 }
  0x7b   :  { %v149_v30 = vadd.f32 %v105_v62, %v53_v47  ;;  %v147_v31 = vadd.f32 %v101_v63, %v51_v42  ;;  %v166_v42 = vmul.f32 0.375, %v959_v41  ;;  %v168_v41 = vmul.f32 0.375, %v973_v45 }
  0x7c   :  { %524 = vrot.lane.b32.xlu1 %v479_v15, %s784_s23  ;;  %522 = vrot.lane.b32.xlu0 %v478_v14, %s784_s23  ;;  %v57_v15 = vmul.f32 0.125, %v856_v12  ;;  %v56_v14 = vmul.f32 0.125, %v861_v13  ;;  %v59_v12 = vmul.f32 0.125, %v870_v16  ;;  %v58_v13 = vmul.f32 0.125, %v875_v17 }
  0x7d   :  { %v1273_v0 = vadd.f32 %v163_v2, %v147_v31  ;;  %v1275_v36 = vadd.f32 %v165_v58, %v149_v30  ;;  %v173_v17 = vmul.f32 0.375, %v996_v52 }
  0x7e   :  { %v109_v47 = vpop.permute.xlu1 %108  ;;  %v107_v8 = vpop.permute.xlu0 %106 }
  0x7f   :  { %v151_v1 = vadd.f32 %v109_v47, %v55_v50  ;;  %v150_v9 = vadd.f32 %v107_v8, %v54_v51  ;;  %v61_v47 = vmul.f32 0.125, %v884_v20  ;;  %v60_v8 = vmul.f32 0.125, %v889_v21 }
  0x80   :  { %528 = vrot.lane.b32.xlu1 %v481_v32, %s784_s23  ;;  %526 = vrot.lane.b32.xlu0 %v480_v46, %s784_s23  ;;  %v171_v32 = vmul.f32 0.375, %v982_v48  ;;  %v170_v46 = vmul.f32 0.375, %v987_v49  ;;  %v175_v21 = vmul.f32 0.375, %v1010_v56  ;;  %s745_s23 = sshll.u32 %s785_s3, 4  ;;  %s746_s23 = int_to_ptr.vmem [resolvable:$true] %s745_s23 }
  0x81   :  { %v1283_v2 = vadd.f32 %v167_v43, %v151_v1  ;;  %v1285_v58 = vadd.f32 %v166_v42, %v150_v9  ;;  %v172_v9 = vmul.f32 0.375, %v1001_v53  ;;  %s760_s2 = scalar_lea.vmem %s746_s23, 1024  ;;  %p765_p1 = scmp.lt.s32.totalorder %s746_s23, %s746_s23 }
  0x82   :  { %v113_v62 = vpop.permute.xlu1 %112  ;;  %v111_v63 = vpop.permute.xlu0 %110  ;;  %p761_p0 = scmp.ne.s32.totalorder %s746_s23, %s760_s2  ;;  %p766_p2 = scmp.lt.s32.totalorder %s760_s2, %s760_s2 }
  0x83   :  { %v153_v50 = vadd.f32 %v113_v62, %v57_v15  ;;  %v152_v51 = vadd.f32 %v111_v63, %v56_v14  ;;  %v174_v63 = vmul.f32 0.375, %v1015_v57 }
  0x84   :  { %p767_p3 = por %p766_p2, %p765_p1 }
  0x85   :  { %v1291_v30 = vadd.f32 %v169_v40, %v153_v50  ;;  %v1293_v31 = vadd.f32 %v168_v41, %v152_v51  ;;  %v63_v40 = vmul.f32 0.125, %v898_v24  ;;  %v62_v41 = vmul.f32 0.125, %v903_v25 }
  0x86   :  { %v117_v43 = vpop.permute.xlu1 %116  ;;  %v115_v44 = vpop.permute.xlu0 %114  ;;  %v177_v25 = vmul.f32 0.375, %v1024_v60  ;;  %p768_p4 = pnand %p767_p3, %p761_p0 }
  0x87   :  { %v155_v42 = vadd.f32 %v117_v43, %v59_v12  ;;  %v154_v45 = vadd.f32 %v115_v44, %v58_v13  ;;  %v65_v12 = vmul.f32 0.125, %v912_v28  ;;  %v64_v13 = vmul.f32 0.125, %v917_v29 }
  0x89   :  { %v1299_v1 = vadd.f32 %v171_v32, %v155_v42  ;;  %v1301_v16 = vadd.f32 %v170_v46, %v154_v45  ;;  %v176_v46 = vmul.f32 0.375, %v1029_v61 }
  0x8a   :  { %v121_v15 = vpop.permute.xlu1 %120  ;;  %v119_v48 = vpop.permute.xlu0 %118 }
  0x8b   :  { %v157_v14 = vadd.f32 %v121_v15, %v61_v47  ;;  %v156_v49 = vadd.f32 %v119_v48, %v60_v8 }
  0x8d   :  { %v1307_v62 = vadd.f32 %v173_v17, %v157_v14  ;;  %v1309_v20 = vadd.f32 %v172_v9, %v156_v49 }
  0x8e   :  { %v125_v50 = vpop.permute.xlu1 %124  ;;  %v123_v52 = vpop.permute.xlu0 %122 }
  0x8f   :  { %v159_v51 = vadd.f32 %v125_v50, %v63_v40  ;;  %v158_v53 = vadd.f32 %v123_v52, %v62_v41 }
  0x91   :  { %v1315_v32 = vadd.f32 %v175_v21, %v159_v51  ;;  %v1317_v24 = vadd.f32 %v174_v63, %v158_v53 }
  0x92   :  { %v129_v43 = vpop.permute.xlu1 %128  ;;  %v127_v56 = vpop.permute.xlu0 %126 }
  0x93   :  { %v161_v44 = vadd.f32 %v129_v43, %v65_v12  ;;  %v160_v57 = vadd.f32 %v127_v56, %v64_v13 }
  0x95   :  { %v1321_v42 = vadd.f32 %v177_v25, %v161_v44  ;;  %v1323_v45 = vadd.f32 %v176_v46, %v160_v57 }
  0x96   :  { %v229_v47 = vpop.permute.xlu1 %228  ;;  %v227_v28 = vpop.permute.xlu0 %226 }
  0x97   :  { %v275_v29 = vadd.f32 %v229_v47, %v1273_v0  ;;  %v274_v8 = vadd.f32 %v227_v28, %v1262_v5 }
  0x99   :  { %v571_v17 = vmul.f32 0.375, %v275_v29  ;;  %v570_v9 = vmul.f32 0.375, %v274_v8  ;;  %v562_v40 = vmul.f32 0.125, %v274_v8 }
  0x9a   :  { %v233_v60 = vpop.permute.xlu1 %232  ;;  %v231_v15 = vpop.permute.xlu0 %230 }
  0x9b   :  { %v604_v61 = vrot.slane %v571_v17, 1  ;;  %v603_v48 = vrot.slane %v570_v9, 1  ;;  %v277_v14 = vadd.f32 %v233_v60, %v1275_v36  ;;  %v276_v49 = vadd.f32 %v231_v15, %v1265_v59 }
  0x9d   :  { %v605_v41 = vsel %vm602_vm0, %v603_v48, %v604_v61  ;;  %v573_v21 = vmul.f32 0.375, %v277_v14  ;;  %v572_v63 = vmul.f32 0.375, %v276_v49  ;;  %v563_v13 = vmul.f32 0.125, %v276_v49 }
  0x9e   :  { %v1330_v50 = vadd.f32 %v605_v41, %v562_v40  ;;  %v237_v0 = vpop.permute.xlu1 %236  ;;  %v235_v5 = vpop.permute.xlu0 %234 }
  0x9f   :  { %v607_v52 = vrot.slane %v573_v21, 1  ;;  %v606_v51 = vrot.slane %v572_v63, 1  ;;  %v279_v53 = vadd.f32 %v237_v0, %v1283_v2  ;;  %v278_v12 = vadd.f32 %v235_v5, %v1285_v58 }
  0xa1   :  { %v608_v36 = vsel %vm602_vm0, %v606_v51, %v607_v52  ;;  %v575_v25 = vmul.f32 0.375, %v279_v53  ;;  %v574_v59 = vmul.f32 0.375, %v278_v12  ;;  %v564_v29 = vmul.f32 0.125, %v278_v12 }
  0xa2   :  { %v1335_v46 = vadd.f32 %v608_v36, %v563_v13  ;;  %v241_v43 = vpop.permute.xlu1 %240  ;;  %v239_v56 = vpop.permute.xlu0 %238 }
  0xa3   :  { %v610_v44 = vrot.slane %v575_v25, 1  ;;  %v609_v57 = vrot.slane %v574_v59, 1  ;;  %v281_v47 = vadd.f32 %v241_v43, %v1291_v30  ;;  %v280_v28 = vadd.f32 %v239_v56, %v1293_v31 }
  0xa5   :  { %v611_v2 = vsel %vm602_vm0, %v609_v57, %v610_v44  ;;  %v577_v8 = vmul.f32 0.375, %v281_v47  ;;  %v576_v58 = vmul.f32 0.375, %v280_v28  ;;  %v565_v49 = vmul.f32 0.125, %v280_v28 }
  0xa6   :  { %v1340_v17 = vadd.f32 %v611_v2, %v564_v29  ;;  %v245_v9 = vpop.permute.xlu1 %244  ;;  %v243_v60 = vpop.permute.xlu0 %242 }
  0xa7   :  { %v613_v15 = vrot.slane %v577_v8, 1  ;;  %v612_v61 = vrot.slane %v576_v58, 1  ;;  %v283_v48 = vadd.f32 %v245_v9, %v1299_v1  ;;  %v282_v14 = vadd.f32 %v243_v60, %v1301_v16 }
  0xa8   :  { %v323_v8 = vmul.f32 0.125, %v1038_v3  ;;  %v322_v58 = vmul.f32 0.125, %v1043_v4  ;;  %v325_v4 = vmul.f32 0.125, %v1052_v10 }
  0xa9   :  { %v614_v30 = vsel %vm602_vm0, %v612_v61, %v613_v15  ;;  %v579_v40 = vmul.f32 0.375, %v283_v48  ;;  %v578_v31 = vmul.f32 0.375, %v282_v14  ;;  %v566_v53 = vmul.f32 0.125, %v282_v14 }
  0xaa   :  { %v1345_v41 = vadd.f32 %v614_v30, %v565_v49  ;;  %v249_v21 = vpop.permute.xlu1 %248  ;;  %v247_v63 = vpop.permute.xlu0 %246  ;;  %v435_v61 = vmul.f32 0.375, %v1150_v6  ;;  %v434_v30 = vmul.f32 0.375, %v1155_v7  ;;  %v437_v6 = vmul.f32 0.375, %v1164_v22 }
  0xab   :  { %v616_v0 = vrot.slane %v579_v40, 1  ;;  %v615_v5 = vrot.slane %v578_v31, 1  ;;  %v285_v52 = vadd.f32 %v249_v21, %v1307_v62  ;;  %v284_v51 = vadd.f32 %v247_v63, %v1309_v20 }
  0xac   :  { %v324_v21 = vmul.f32 0.125, %v1057_v11 }
  0xad   :  { %v617_v1 = vsel %vm602_vm0, %v615_v5, %v616_v0  ;;  %v581_v12 = vmul.f32 0.375, %v285_v52  ;;  %v580_v16 = vmul.f32 0.375, %v284_v51  ;;  %v567_v57 = vmul.f32 0.125, %v284_v51 }
  0xae   :  { %v1350_v13 = vadd.f32 %v617_v1, %v566_v53  ;;  %v253_v36 = vpop.permute.xlu1 %252  ;;  %v251_v25 = vpop.permute.xlu0 %250  ;;  %v436_v53 = vmul.f32 0.375, %v1169_v23 }
  0xaf   :  { %v619_v59 = vrot.slane %v581_v12, 1  ;;  %v618_v43 = vrot.slane %v580_v16, 1  ;;  %v287_v56 = vadd.f32 %v253_v36, %v1315_v32  ;;  %v286_v44 = vadd.f32 %v251_v25, %v1317_v24 }
  0xb0   :  { %v327_v36 = vmul.f32 0.125, %v1066_v18  ;;  %v326_v25 = vmul.f32 0.125, %v1071_v19  ;;  %v441_v19 = vmul.f32 0.375, %v1192_v54 }
  0xb1   :  { %v620_v62 = vsel %vm602_vm0, %v618_v43, %v619_v59  ;;  %v583_v47 = vmul.f32 0.375, %v287_v56  ;;  %v582_v20 = vmul.f32 0.375, %v286_v44  ;;  %v568_v24 = vmul.f32 0.125, %v286_v44 }
  0xb2   :  { %v1355_v28 = vadd.f32 %v620_v62, %v567_v57  ;;  %v257_v29 = vpop.permute.xlu1 %256  ;;  %v255_v2 = vpop.permute.xlu0 %254  ;;  %v439_v43 = vmul.f32 0.375, %v1178_v38  ;;  %v438_v56 = vmul.f32 0.375, %v1183_v39 }
  0xb3   :  { %v622_v9 = vrot.slane %v583_v47, 1  ;;  %v621_v60 = vrot.slane %v582_v20, 1  ;;  %v289_v15 = vadd.f32 %v257_v29, %v1321_v42  ;;  %v288_v32 = vadd.f32 %v255_v2, %v1323_v45 }
  0xb4   :  { %v329_v47 = vmul.f32 0.125, %v1080_v26  ;;  %v328_v20 = vmul.f32 0.125, %v1085_v27  ;;  %v440_v2 = vmul.f32 0.375, %v1197_v55  ;;  %v1510_v27 = vld [vmem:[#allocation11_spill] sm:$0xff] }
  0xb5   :  { %v623_v48 = vsel %vm602_vm0, %v621_v60, %v622_v9  ;;  %v585_v14 = vmul.f32 0.375, %v289_v15  ;;  %v584_v49 = vmul.f32 0.375, %v288_v32  ;;  %v569_v5 = vmul.f32 0.125, %v288_v32 }
  0xb6   :  { %v1364_v40 = vadd.f32 %v623_v48, %v568_v24  ;;  %v373_v3 = vpop.permute.xlu1 %372  ;;  %v371_v31 = vpop.permute.xlu0 %370  ;;  %v331_v9 = vmul.f32 0.125, %v1094_v34  ;;  %v330_v60 = vmul.f32 0.125, %v1099_v35  ;;  %v443_v32 = vmul.f32 0.375, %v1510_v27  ;;  %v1511_v24 = vld [vmem:[#allocation12_spill] sm:$0xff]  ;;  %v1514_v35 = vld [vmem:[#allocation13_spill] sm:$0xff] }
  0xb7   :  { %v625_v42 = vrot.slane %v585_v14, 1  ;;  %v624_v63 = vrot.slane %v584_v49, 1  ;;  %v419_v45 = vadd.f32 %v373_v3, %v323_v8  ;;  %v418_v0 = vadd.f32 %v371_v31, %v322_v58  ;;  %v1512_v49 = vld [vmem:[#allocation5_spill] sm:$0xff]  ;;  %v1513_v3 = vld [vmem:[#allocation6_spill] sm:$0xff] }
  0xb8   :  { %v332_v31 = vmul.f32 0.125, %v1513_v3 }
  0xb9   :  { %v626_v52 = vsel %vm602_vm0, %v624_v63, %v625_v42  ;;  %v1370_v51 = vadd.f32 %v435_v61, %v419_v45  ;;  %v1372_v7 = vadd.f32 %v434_v30, %v418_v0  ;;  %v442_v61 = vmul.f32 0.375, %v1511_v24  ;;  %v1515_v42 = vld [vmem:[#allocation14_spill] sm:$0xff] }
  0xba   :  { %v1375_v1 = vadd.f32 %v626_v52, %v569_v5  ;;  %v377_v10 = vpop.permute.xlu1 %376  ;;  %v375_v12 = vpop.permute.xlu0 %374  ;;  %v333_v30 = vmul.f32 0.125, %v1512_v49  ;;  %v444_v63 = vmul.f32 0.375, %v1515_v42  ;;  %v1516_v52 = vld [vmem:[#allocation7_spill] sm:$0xff] }
  0xbb   :  { %v421_v11 = vadd.f32 %v377_v10, %v325_v4  ;;  %v420_v16 = vadd.f32 %v375_v12, %v324_v21  ;;  %v445_v21 = vmul.f32 0.375, %v1514_v35  ;;  %v1517_v10 = vld [vmem:[#allocation8_spill] sm:$0xff] }
  0xbc   :  { %v334_v12 = vmul.f32 0.125, %v1517_v10 }
  0xbd   :  { %v1379_v59 = vadd.f32 %v437_v6, %v421_v11  ;;  %v1381_v22 = vadd.f32 %v436_v53, %v420_v16  ;;  %v335_v53 = vmul.f32 0.125, %v1516_v52 }
  0xbe   :  { %v381_v44 = vpop.permute.xlu1 %380  ;;  %v379_v23 = vpop.permute.xlu0 %378 }
  0xbf   :  { %v423_v57 = vadd.f32 %v381_v44, %v327_v36  ;;  %v422_v62 = vadd.f32 %v379_v23, %v326_v25  ;;  %v1518_v36 = vld [vmem:[#allocation15_spill] sm:$0xff] }
  0xc0   :  { %v447_v25 = vmul.f32 0.375, %v1518_v36 }
  0xc1   :  { %v1387_v29 = vadd.f32 %v439_v43, %v423_v57  ;;  %v1389_v18 = vadd.f32 %v438_v56, %v422_v62  ;;  %v1519_v43 = vld [vmem:[#allocation16_spill] sm:$0xff] }
  0xc2   :  { %v385_v8 = vpop.permute.xlu1 %384  ;;  %v383_v38 = vpop.permute.xlu0 %382  ;;  %v446_v56 = vmul.f32 0.375, %v1519_v43 }
  0xc3   :  { %v425_v58 = vadd.f32 %v385_v8, %v329_v47  ;;  %v424_v39 = vadd.f32 %v383_v38, %v328_v20  ;;  %v1520_v47 = vld [vmem:[#allocation9_spill] sm:$0xff] }
  0xc4   :  { %v337_v20 = vmul.f32 0.125, %v1520_v47 }
  0xc5   :  { %v1395_v15 = vadd.f32 %v441_v19, %v425_v58  ;;  %v1397_v26 = vadd.f32 %v440_v2, %v424_v39  ;;  %v1521_v19 = vld [vmem:[#allocation10_spill] sm:$0xff]  ;;  %v449_v58 = vmul.f32 0.375, %v1254_v33  ;;  %v448_v39 = vmul.f32 0.375, %v1259_v37 }
  0xc6   :  { %v389_v48 = vpop.permute.xlu1 %388  ;;  %v387_v54 = vpop.permute.xlu0 %386  ;;  %v336_v2 = vmul.f32 0.125, %v1521_v19 }
  0xc7   :  { %v427_v14 = vadd.f32 %v389_v48, %v331_v9  ;;  %v426_v55 = vadd.f32 %v387_v54, %v330_v60 }
  0xc9   :  { %v1403_v4 = vadd.f32 %v443_v32, %v427_v14  ;;  %v1405_v34 = vadd.f32 %v442_v61, %v426_v55 }
  0xca   :  { %v393_v45 = vpop.permute.xlu1 %392  ;;  %v391_v0 = vpop.permute.xlu0 %390 }
  0xcb   :  { %v429_v5 = vadd.f32 %v393_v45, %v333_v30  ;;  %v428_v6 = vadd.f32 %v391_v0, %v332_v31 }
  0xcd   :  { %v1411_v11 = vadd.f32 %v445_v21, %v429_v5  ;;  %v1413_v16 = vadd.f32 %v444_v63, %v428_v6 }
  0xce   :  { %v397_v44 = vpop.permute.xlu1 %396  ;;  %v395_v23 = vpop.permute.xlu0 %394 }
  0xcf   :  { %v431_v57 = vadd.f32 %v397_v44, %v335_v53  ;;  %v430_v62 = vadd.f32 %v395_v23, %v334_v12 }
  0xd1   :  { %v1419_v8 = vadd.f32 %v447_v25, %v431_v57  ;;  %v1421_v38 = vadd.f32 %v446_v56, %v430_v62 }
  0xd2   :  { %v401_v9 = vpop.permute.xlu1 %400  ;;  %v399_v60 = vpop.permute.xlu0 %398 }
  0xd3   :  { %v433_v27 = vadd.f32 %v401_v9, %v337_v20  ;;  %v432_v32 = vadd.f32 %v399_v60, %v336_v2 }
  0xd5   :  { %v1425_v24 = vadd.f32 %v449_v58, %v433_v27  ;;  %v1427_v61 = vadd.f32 %v448_v39, %v432_v32 }
  0xd6   :  { %v501_v48 = vpop.permute.xlu1 %500  ;;  %v499_v54 = vpop.permute.xlu0 %498 }
  0xd7   :  { %v547_v14 = vadd.f32 %v501_v48, %v1370_v51  ;;  %v546_v55 = vadd.f32 %v499_v54, %v1372_v7 }
  0xd9   :  { %v660_v49 = vmul.f32 0.125, %v547_v14  ;;  %v643_v30 = vmul.f32 0.375, %v546_v55  ;;  %v659_v3 = vmul.f32 0.125, %v546_v55 }
  0xda   :  { %v505_v33 = vpop.permute.xlu1 %504  ;;  %v503_v31 = vpop.permute.xlu0 %502 }
  0xdb   :  { %v692_v37 = vrot.slane %v660_v49, 1  ;;  %v651_v35 = vadd.f32 %v643_v30, %v1330_v50  ;;  %v691_v21 = vrot.slane %v659_v3, 1  ;;  %v549_v42 = vadd.f32 %v505_v33, %v1379_v59 }
  0xdc   :  { %v548_v63 = vadd.f32 %v503_v31, %v1381_v22 }
  0xdd   :  { %v693_v45 = vsel %vm602_vm0, %v691_v21, %v692_v37  ;;  %v662_v0 = vmul.f32 0.125, %v549_v42 }
  0xde   :  { %v723_v51 = vadd.f32 %v693_v45, %v651_v35  ;;  %v644_v5 = vmul.f32 0.375, %v548_v63  ;;  %v661_v7 = vmul.f32 0.125, %v548_v63  ;;  %v509_v6 = vpop.permute.xlu1 %508  ;;  %v507_v52 = vpop.permute.xlu0 %506 }
  0xdf   :  { %v695_v53 = vrot.slane %v662_v0, 1  ;;  %v551_v10 = vadd.f32 %v509_v6, %v1387_v29  ;;  %v550_v12 = vadd.f32 %v507_v52, %v1389_v18 }
  0xe0   :  { %732 = vst.msk [vmem:[#allocation2] sm:$0xff] %vm731_vm1, %v723_v51  ;;  %v652_v50 = vadd.f32 %v644_v5, %v1335_v46  ;;  %v694_v59 = vrot.slane %v661_v7, 1 }
  0xe1   :  { %v664_v22 = vmul.f32 0.125, %v551_v10  ;;  %v645_v36 = vmul.f32 0.375, %v550_v12  ;;  %v663_v25 = vmul.f32 0.125, %v550_v12 }
  0xe2   :  { %v696_v43 = vsel %vm602_vm0, %v694_v59, %v695_v53  ;;  %v513_v56 = vpop.permute.xlu1 %512  ;;  %v511_v44 = vpop.permute.xlu0 %510 }
  0xe3   :  { %v724_v23 = vadd.f32 %v696_v43, %v652_v50  ;;  %v698_v57 = vrot.slane %v664_v22, 1  ;;  %v653_v62 = vadd.f32 %v645_v36, %v1340_v17  ;;  %v697_v47 = vrot.slane %v663_v25, 1 }
  0xe4   :  { %v553_v29 = vadd.f32 %v513_v56, %v1395_v15  ;;  %v552_v18 = vadd.f32 %v511_v44, %v1397_v26 }
  0xe5   :  { %733 = vst.msk [vmem:[#allocation2 + $0x8] sm:$0xff] %vm731_vm1, %v724_v23  ;;  %v699_v46 = vsel %vm602_vm0, %v697_v47, %v698_v57 }
  0xe6   :  { %v725_v20 = vadd.f32 %v699_v46, %v653_v62  ;;  %v666_v19 = vmul.f32 0.125, %v553_v29  ;;  %v646_v2 = vmul.f32 0.375, %v552_v18  ;;  %v665_v58 = vmul.f32 0.125, %v552_v18  ;;  %v517_v39 = vpop.permute.xlu1 %516  ;;  %v515_v9 = vpop.permute.xlu0 %514 }
  0xe7   :  { %v555_v60 = vadd.f32 %v517_v39, %v1403_v4  ;;  %v554_v27 = vadd.f32 %v515_v9, %v1405_v34 }
  0xe8   :  { %734 = vst.msk [vmem:[#allocation2 + $0x10] sm:$0xff] %vm731_vm1, %v725_v20  ;;  %v701_v17 = vrot.slane %v666_v19, 1  ;;  %v654_v15 = vadd.f32 %v646_v2, %v1345_v41  ;;  %v700_v26 = vrot.slane %v665_v58, 1 }
  0xe9   :  { %v668_v32 = vmul.f32 0.125, %v555_v60  ;;  %v647_v48 = vmul.f32 0.375, %v554_v27  ;;  %v667_v54 = vmul.f32 0.125, %v554_v27 }
  0xea   :  { %v702_v14 = vsel %vm602_vm0, %v700_v26, %v701_v17  ;;  %v521_v55 = vpop.permute.xlu1 %520  ;;  %v519_v49 = vpop.permute.xlu0 %518 }
  0xeb   :  { %v726_v30 = vadd.f32 %v702_v14, %v654_v15  ;;  %v704_v3 = vrot.slane %v668_v32, 1  ;;  %v655_v33 = vadd.f32 %v647_v48, %v1350_v13  ;;  %v703_v4 = vrot.slane %v667_v54, 1 }
  0xec   :  { %v557_v34 = vadd.f32 %v521_v55, %v1411_v11  ;;  %v556_v31 = vadd.f32 %v519_v49, %v1413_v16 }
  0xed   :  { %735 = vst.msk [vmem:[#allocation2 + $0x18] sm:$0xff] %vm731_vm1, %v726_v30  ;;  %v705_v41 = vsel %vm602_vm0, %v703_v4, %v704_v3 }
  0xee   :  { %v727_v37 = vadd.f32 %v705_v41, %v655_v33  ;;  %v670_v35 = vmul.f32 0.125, %v557_v34  ;;  %v648_v21 = vmul.f32 0.375, %v556_v31  ;;  %v669_v42 = vmul.f32 0.125, %v556_v31  ;;  %v525_v63 = vpop.permute.xlu1 %524  ;;  %v523_v45 = vpop.permute.xlu0 %522 }
  0xef   :  { %v559_v0 = vadd.f32 %v525_v63, %v1419_v8  ;;  %v558_v51 = vadd.f32 %v523_v45, %v1421_v38 }
  0xf0   :  { %736 = vst.msk [vmem:[#allocation2 + $0x20] sm:$0xff] %vm731_vm1, %v727_v37  ;;  %v707_v13 = vrot.slane %v670_v35, 1  ;;  %v656_v11 = vadd.f32 %v648_v21, %v1355_v28  ;;  %v706_v16 = vrot.slane %v669_v42, 1 }
  0xf1   :  { %v672_v5 = vmul.f32 0.125, %v559_v0  ;;  %v649_v7 = vmul.f32 0.375, %v558_v51  ;;  %v671_v6 = vmul.f32 0.125, %v558_v51 }
  0xf2   :  { %v708_v52 = vsel %vm602_vm0, %v706_v16, %v707_v13  ;;  %v529_v53 = vpop.permute.xlu1 %528  ;;  %v527_v10 = vpop.permute.xlu0 %526 }
  0xf3   :  { %v728_v12 = vadd.f32 %v708_v52, %v656_v11  ;;  %v710_v50 = vrot.slane %v672_v5, 1  ;;  %v657_v59 = vadd.f32 %v649_v7, %v1364_v40  ;;  %v709_v8 = vrot.slane %v671_v6, 1 }
  0xf4   :  { %v561_v38 = vadd.f32 %v529_v53, %v1425_v24  ;;  %v560_v22 = vadd.f32 %v527_v10, %v1427_v61 }
  0xf5   :  { %737 = vst.msk [vmem:[#allocation2 + $0x28] sm:$0xff] %vm731_vm1, %v728_v12  ;;  %v711_v28 = vsel %vm602_vm0, %v709_v8, %v710_v50 }
  0xf6   :  { %v729_v36 = vadd.f32 %v711_v28, %v657_v59  ;;  %v674_v25 = vmul.f32 0.125, %v561_v38  ;;  %v650_v43 = vmul.f32 0.375, %v560_v22  ;;  %v673_v56 = vmul.f32 0.125, %v560_v22 }
  0xf8   :  { %738 = vst.msk [vmem:[#allocation2 + $0x30] sm:$0xff] %vm731_vm1, %v729_v36  ;;  %v713_v44 = vrot.slane %v674_v25, 1  ;;  %v658_v40 = vadd.f32 %v650_v43, %v1375_v1  ;;  %v712_v23 = vrot.slane %v673_v56, 1 }
  0xfa   :  { %v714_v24 = vsel %vm602_vm0, %v712_v23, %v713_v44 }
  0xfb   :  { %v730_v61 = vadd.f32 %v714_v24, %v658_v40 }
  0xfd   :  { %739 = vst.msk [vmem:[#allocation2 + $0x38] sm:$0xff] %vm731_vm1, %v730_v61 }
  0xfe   :  { %771 = shalt.err (!%p768_p4)
}
  0xff   :  { %s772_s12 = scalar_lea.hbm %s1485_s4, 1024 }
 0x100   :  { %p773_p5 = scmp.ne.s32.totalorder %s1485_s4, %s772_s12  ;;  %p776_p6 = scmp.lt.u32.totalorder %s772_s12, %s1485_s4 }
 0x102   :  { %p778_p7 = pnand %p776_p6, %p773_p5 }
 0x104   :  { %781 = shalt.err (!%p778_p7)
}
 0x105   :  { %s786_s17 = smov 128   ;;  %s787_s18 = smov 8  }
 0x106   :  { %751 = dma.vmem_to_hbm [thread:$0]  %s746_s23, 1024, %s1485_s4, [#allocation3], %s786_s17, %s786_s17, %s787_s18  }
 0x107   :  { %782 = dma.done.wait [#allocation3], 1024  }
 0x108   :  { %783 = vsyncadd [#allocation3], 4294966272 }
 0x109   :  { %755 = vsyncpa [#allocation3], 1 }

</bundles_post_ra>
